<compile_context>
chip_gen: v6e
topology: v6e:2x2x1
jax: 0.10.0
libtpu: 0.0.40
codegen_flags: <defaults>
</compile_context>

<pallas_src>
import jax
import jax.numpy as jnp
from jax.experimental import pallas as pl
from jax.experimental.pallas import tpu as pltpu


class PallasLambda:
    """JAX/Pallas equivalent of torch `Lambda(func)` for elementwise funcs.

    forward(x) == func(x), with func evaluated inside a Pallas TPU kernel.
    """

    # Single-block cutoff: inputs at or below this size are processed as one
    # full-array VMEM block with no grid (no per-step pipeline overhead).
    _SMALL_BYTES = 2 * 1024 * 1024
    # Per-buffer tile target for the tiled (large-input) path.
    _TILE_BYTES = 2 * 1024 * 1024
    _WIDE_LANES = 1024  # 8 * 128 — lane-dense last dim for unmasked stores

    def __init__(self, func):
        self.func = func

    def _kernel(self, x_ref, o_ref):
        # Apply the wrapped function to the whole VMEM tile (VPU/EUP path).
        o_ref[...] = self.func(x_ref[...]).astype(o_ref.dtype)

    def __call__(self, x):
        orig_shape = x.shape
        # Preserve the wrapped func's output dtype (torch Lambda returns
        # whatever func produces).
        out_dtype = jax.eval_shape(
            self.func, jax.ShapeDtypeStruct(x.shape, x.dtype)
        ).dtype

        total = x.size
        itemsize = jnp.dtype(x.dtype).itemsize
        x_flat = jnp.ravel(x)  # row-major reshape: metadata-only

        if total * itemsize <= self._SMALL_BYTES:
            # ---- small path: one full-array block, no grid ----
            lanes = 128
            rows = -(-total // lanes)  # ceil
            padded_total = rows * lanes
            if padded_total != total:
                x_flat = jnp.pad(x_flat, (0, padded_total - total))
            x2d = x_flat.reshape(rows, lanes)

            out2d = pl.pallas_call(
                self._kernel,
                out_shape=jax.ShapeDtypeStruct((rows, lanes), out_dtype),
            )(x2d)
        else:
            # ---- large path: lane-dense wide slab, ~2 MiB tiles ----
            lanes = self._WIDE_LANES
            tile_rows = max(8, (self._TILE_BYTES // (lanes * itemsize)) // 8 * 8)
            block_elems = tile_rows * lanes
            n_blocks = -(-total // block_elems)  # ceil
            padded_total = n_blocks * block_elems
            rows_padded = padded_total // lanes
            if padded_total != total:
                x_flat = jnp.pad(x_flat, (0, padded_total - total))
            x2d = x_flat.reshape(rows_padded, lanes)

            out2d = pl.pallas_call(
                self._kernel,
                out_shape=jax.ShapeDtypeStruct((rows_padded, lanes), out_dtype),
                grid=(n_blocks,),
                in_specs=[pl.BlockSpec((tile_rows, lanes), lambda i: (i, 0))],
                out_specs=pl.BlockSpec((tile_rows, lanes), lambda i: (i, 0)),
                compiler_params=pltpu.CompilerParams(
                    dimension_semantics=("parallel",)
                ),
            )(x2d)

        out_flat = out2d.reshape(-1)
        if padded_total != total:
            out_flat = out_flat[:total]
        return out_flat.reshape(orig_shape)


if __name__ == "__main__":
    key = jax.random.PRNGKey(0)

    # Representative wrapped elementwise function (typical Lambda usage in the
    # ANOVA-TPNN codebase).
    func = lambda t: jnp.tanh(t) * 2.0 + 0.5
    lam = PallasLambda(func)

    # 1) Small NCHW feature map (2, 4, 16, 16) -> single-block path.
    x_small = jax.random.normal(key, (2, 4, 16, 16), dtype=jnp.float32)
    y_small = jax.block_until_ready(lam(x_small))
    y_small_ref = func(x_small)
    assert y_small.shape == x_small.shape and y_small.dtype == x_small.dtype
    assert jnp.allclose(y_small, y_small_ref, atol=1e-5, rtol=1e-5), \
        "small-path mismatch vs reference"

    # 2) Larger tensor (8 MiB f32) -> tiled wide-lane path (4 grid steps).
    x_big = jax.random.normal(key, (8, 32, 64, 64), dtype=jnp.float32)
    y_big = jax.block_until_ready(lam(x_big))
    y_big_ref = func(x_big)
    assert y_big.shape == x_big.shape and y_big.dtype == x_big.dtype
    assert jnp.allclose(y_big, y_big_ref, atol=1e-5, rtol=1e-5), \
        "large-path mismatch vs reference"

    print("KERNEL_OK")
</pallas_src>

<mosaic_0001>
module attributes {stable_mosaic.version = 11 : i64} {
  func.func @_kernel(%arg0: memref<16x128xf32, #tpu.memory_space<vmem>>, %arg1: memref<16x128xf32, #tpu.memory_space<vmem>>) attributes {dimension_semantics = [], scalar_prefetch = 0 : i64, scratch_operands = 0 : i64, tpu.core_type = #tpu.core_type<tc>} {
    %c0 = arith.constant 0 : index
    %c0_0 = arith.constant 0 : index
    %0 = vector.load %arg0[%c0, %c0_0] : memref<16x128xf32, #tpu.memory_space<vmem>>, vector<16x128xf32>
    %1 = math.tanh %0 : vector<16x128xf32>
    %cst = arith.constant 2.000000e+00 : f32
    %2 = vector.broadcast %cst : f32 to vector<16x128xf32>
    %3 = arith.mulf %1, %2 : vector<16x128xf32>
    %cst_1 = arith.constant 5.000000e-01 : f32
    %4 = vector.broadcast %cst_1 : f32 to vector<16x128xf32>
    %5 = arith.addf %3, %4 : vector<16x128xf32>
    %c0_2 = arith.constant 0 : index
    %c0_3 = arith.constant 0 : index
    %6 = vector.load %arg1[%c0_2, %c0_3] : memref<16x128xf32, #tpu.memory_space<vmem>>, vector<16x128xf32>
    tpu.vector_store %arg1[%c0_2, %c0_3], %5 {strides = array<i32>} : memref<16x128xf32, #tpu.memory_space<vmem>>, vector<16x128xf32>,
    return
  }
}

</mosaic_0001>

<bundles_post_ra>
// kernel: tpu_custom_call.1
= control target key start
LH: loop header
LB: loop body
LE: loop exit
PB: predicated region body
PF: predicated region fallthrough
CT: control target
= control target key end

     0   :  { %6 = vsyncpa [#allocation3], 0  ;;  %s128_s0 = inlined_call_operand.hbm [shape: f32[16,128], index: 0, kind: input, shape index: {}]   ;;  %s129_s1 = inlined_call_operand.hbm [shape: f32[16,128], index: 1, kind: output, shape index: {}]  }
   0x1   :  { %7 = vsyncpa [#allocation4], 0  ;;  %s102_s6 = smov [#allocation2]  }
   0x2   :  { %s13_s7 = sshll.u32 %s102_s6, 4  ;;  %s14_s7 = int_to_ptr.vmem [resolvable:$true] %s13_s7 }
   0x3   :  { %s66_s8 = scalar_lea.vmem %s14_s7, 256  ;;  %p71_p1 = scmp.lt.s32.totalorder %s14_s7, %s14_s7 }
   0x4   :  { %p67_p0 = scmp.ne.s32.totalorder %s14_s7, %s66_s8  ;;  %p72_p2 = scmp.lt.s32.totalorder %s66_s8, %s66_s8 }
   0x6   :  { %p73_p3 = por %p72_p2, %p71_p1 }
   0x8   :  { %p74_p4 = pnand %p73_p3, %p67_p0 }
   0xa   :  { %77 = shalt.err (!%p74_p4)
}
   0xb   :  { %s103_s9 = smov 128   ;;  %s104_s10 = smov 8  }
   0xc   :  { %19 = dma.hbm_to_vmem [thread:$0]  %s128_s0, 256, %s14_s7, [#allocation3], %s103_s9, %s103_s9, %s104_s10  }
   0xd   :  { %98 = dma.done.wait [#allocation3], 256  }
   0xe   :  { %99 = vsyncadd [#allocation3], 4294967040  ;;  %v23_v0 = vld [vmem:[#allocation2] sm:$0xff]  ;;  %v24_v1 = vld [vmem:[#allocation2 + $0x8] sm:$0xff]  ;;  %s105_s13 = smov [#allocation5]  }
   0xf   :  { %54 = vtanh.f32 %v23_v0  ;;  %s38_s14 = sshll.u32 %s105_s13, 4  ;;  %s39_s14 = int_to_ptr.vmem [resolvable:$true] %s38_s14 }
  0x10   :  { %56 = vtanh.f32 %v24_v1  ;;  %s78_s15 = scalar_lea.vmem %s39_s14, 256  ;;  %p83_p6 = scmp.lt.s32.totalorder %s39_s14, %s39_s14 }
  0x11   :  { %p79_p5 = scmp.ne.s32.totalorder %s39_s14, %s78_s15  ;;  %p84_p7 = scmp.lt.s32.totalorder %s78_s15, %s78_s15 }
  0x13   :  { %p85_p8 = por %p84_p7, %p83_p6 }
  0x15   :  { %p86_p9 = pnand %p85_p8, %p79_p5 }
  0x1c   :  { %v55_v2 = vpop.eup %54 }
  0x1d   :  { %v57_v3 = vpop.eup %56  ;;  %v27_v4 = vmul.f32 2.0, %v55_v2 }
  0x1e   :  { %v28_v5 = vmul.f32 2.0, %v57_v3 }
  0x1f   :  { %v29_v6 = vadd.f32 0.5, %v27_v4 }
  0x20   :  { %v30_v7 = vadd.f32 0.5, %v28_v5 }
  0x21   :  { %31 = vst [vmem:[#allocation5] sm:$0xff] %v29_v6 }
  0x22   :  { %32 = vst [vmem:[#allocation5 + $0x8] sm:$0xff] %v30_v7 }
  0x23   :  { %89 = shalt.err (!%p86_p9)
}
  0x24   :  { %44 = dma.vmem_to_hbm [thread:$0]  %s39_s14, 256, %s129_s1, [#allocation4], %s103_s9, %s103_s9, %s104_s10  }
  0x25   :  { %100 = dma.done.wait [#allocation4], 256  }
  0x26   :  { %101 = vsyncadd [#allocation4], 4294967040 }
  0x27   :  { %48 = vsyncpa [#allocation3], 1 }
  0x28   :  { %49 = vsyncpa [#allocation4], 1 }

</bundles_post_ra>
